<compile_context>
chip_gen: v7x
topology: tpu7x:2x2x1
jax: 0.10.0
libtpu: 0.0.40
codegen_flags: <defaults>
</compile_context>

<pallas_src>
import jax
import jax.numpy as jnp
from jax.experimental import pallas as pl
from jax.experimental.pallas import tpu as pltpu


def linear_kernel(x_ref, wt_ref, b_ref, o_ref):
    # x: [B, IN], wt: [IN, OUT] (pre-transposed at init), b: [1, OUT]
    # Plain NN matmul on the MXU with f32 accumulation; bias added in f32
    # before the cast back to the output dtype (f32 epilogue is also the
    # right choice on v5e, whose VPU has no bf16 path).
    acc = jnp.dot(x_ref[...], wt_ref[...], preferred_element_type=jnp.float32)
    o_ref[...] = (acc + b_ref[...]).astype(o_ref.dtype)


def prepare_params(weight, bias):
    """One-time layout fix at parameter-init time (NOT per forward call).

    PyTorch nn.Linear stores weight as [out_features, in_features]; the kernel
    wants [in_features, out_features] so it can do a plain NN matmul with no
    in-kernel XLU transpose. Bias becomes a [1, OUT] row for a single VPU
    broadcast-add against the f32 accumulator.
    """
    return weight.T, bias.reshape(1, -1)


def simple_model_forward(x, w_t, b2d):
    """y = x @ weight.T + bias, matching torch.nn.Linear semantics.

    Takes the pre-transposed weight [IN, OUT] and 2-D bias [1, OUT] produced
    by prepare_params().
    """
    B, _ = x.shape
    OUT = w_t.shape[1]

    # Whole-array, VMEM-resident specs: no grid, no pipeline, no double
    # buffering — the entire op is one VMEM-resident kernel body.
    vmem_spec = pl.BlockSpec(memory_space=pltpu.MemorySpace.VMEM)
    return pl.pallas_call(
        linear_kernel,
        out_shape=jax.ShapeDtypeStruct((B, OUT), x.dtype),
        in_specs=[vmem_spec, vmem_spec, vmem_spec],
        out_specs=vmem_spec,
    )(x, w_t, b2d)


# Compile once; subsequent calls are a single cached dispatch.
simple_model_forward_jit = jax.jit(simple_model_forward)


if __name__ == "__main__":
    key = jax.random.PRNGKey(0)
    kx, kw, kb = jax.random.split(key, 3)

    # Deterministic parameter init (nn.Linear(8, 8) shapes, PyTorch layout).
    IN_FEATURES, OUT_FEATURES = 8, 8
    bound = 1.0 / (IN_FEATURES ** 0.5)
    weight = jax.random.uniform(
        kw, (OUT_FEATURES, IN_FEATURES), jnp.float32, -bound, bound)
    bias = jax.random.uniform(
        kb, (OUT_FEATURES,), jnp.float32, -bound, bound)

    # One-time layout preparation (the per-call transpose is gone).
    w_t, b2d = prepare_params(weight, bias)

    # Example input mirroring `x = torch.randn(8, 8)`.
    x = jax.random.normal(kx, (8, 8), jnp.float32)

    y = simple_model_forward_jit(x, w_t, b2d)
    y = jax.block_until_ready(y)

    # Correctness check against plain-JAX reference (original param layout).
    y_ref = x @ weight.T + bias
    assert y.shape == (8, 8)
    assert jnp.allclose(y, y_ref, atol=1e-5, rtol=1e-5)

    print("KERNEL_OK")
</pallas_src>

<mosaic_0001>
module attributes {stable_mosaic.version = 11 : i64} {
  func.func @linear_kernel(%arg0: memref<8x8xf32, #tpu.memory_space<vmem>>, %arg1: memref<8x8xf32, #tpu.memory_space<vmem>>, %arg2: memref<1x8xf32, #tpu.memory_space<vmem>>, %arg3: memref<8x8xf32, #tpu.memory_space<vmem>>) attributes {dimension_semantics = [], scalar_prefetch = 0 : i64, scratch_operands = 0 : i64, tpu.core_type = #tpu.core_type<tc>} {
    %c0 = arith.constant 0 : index
    %c0_0 = arith.constant 0 : index
    %0 = vector.load %arg0[%c0, %c0_0] : memref<8x8xf32, #tpu.memory_space<vmem>>, vector<8x8xf32>
    %c0_1 = arith.constant 0 : index
    %c0_2 = arith.constant 0 : index
    %1 = vector.load %arg1[%c0_1, %c0_2] : memref<8x8xf32, #tpu.memory_space<vmem>>, vector<8x8xf32>
    %cst = arith.constant dense<0.000000e+00> : vector<8x8xf32>
    %2 = tpu.matmul %0, %1, %cst {dimension_numbers = #tpu.dot_dimension_numbers<[1], [0], [0], [1], [0, 0, 1, 1], [], []>} : vector<8x8xf32>, vector<8x8xf32>, vector<8x8xf32> -> vector<8x8xf32>
    %c0_3 = arith.constant 0 : index
    %c0_4 = arith.constant 0 : index
    %3 = vector.load %arg2[%c0_3, %c0_4] : memref<1x8xf32, #tpu.memory_space<vmem>>, vector<1x8xf32>
    %4 = vector.broadcast %3 : vector<1x8xf32> to vector<8x8xf32>
    %5 = arith.addf %2, %4 : vector<8x8xf32>
    %c0_5 = arith.constant 0 : index
    %c0_6 = arith.constant 0 : index
    %6 = vector.load %arg3[%c0_5, %c0_6] : memref<8x8xf32, #tpu.memory_space<vmem>>, vector<8x8xf32>
    tpu.vector_store %arg3[%c0_5, %c0_6], %5 {strides = array<i32>} : memref<8x8xf32, #tpu.memory_space<vmem>>, vector<8x8xf32>,
    return
  }
}

</mosaic_0001>

<bundles_post_ra>
// kernel: simple_model_forward.1
= control target key start
LH: loop header
LB: loop body
LE: loop exit
PB: predicated region body
PF: predicated region fallthrough
CT: control target
= control target key end

     0   :  { %8 = vsyncpa [#allocation3], 0  ;;  %s289_s0 = inlined_call_operand.hbm [shape: f32[8,8], index: 0, kind: input, shape index: {}]   ;;  %s290_s1 = inlined_call_operand.hbm [shape: f32[8,8], index: 1, kind: input, shape index: {}]   ;;  %s291_s2 = inlined_call_operand.vmem [shape: f32[1,8], index: 2, kind: input, shape index: {}]   ;;  %s292_s3 = inlined_call_operand.hbm [shape: f32[8,8], index: 3, kind: output, shape index: {}]  }
   0x1   :  { %9 = vsyncpa [#allocation6], 0 }
   0x2   :  { %10 = vsyncpa [#allocation4], 0  ;;  %s225_s12 = smov [#allocation2]   ;;  %s226_s14 = smov [#allocation5]  }
   0x3   :  { %s17_s13 = sshll.u32 %s225_s12, 4  ;;  %s27_s15 = sshll.u32 %s226_s14, 4  ;;  %s18_s13 = int_to_ptr.vmem [resolvable:$true] %s17_s13  ;;  %s28_s15 = int_to_ptr.vmem [resolvable:$true] %s27_s15 }
   0x4   :  { %s153_s18 = scalar_lea.hbm %s289_s0, 128 }
   0x5   :  { %p154_p0 = scmp.ne.s32.totalorder %s289_s0, %s153_s18  ;;  %p157_p1 = scmp.lt.u32.totalorder %s153_s18, %s289_s0 }
   0x7   :  { %p159_p2 = pnand %p157_p1, %p154_p0 }
   0x9   :  { %162 = shalt.err (!%p159_p2)
}
   0xa   :  { %s163_s23 = scalar_lea.vmem %s18_s13, 128  ;;  %p168_p4 = scmp.lt.s32.totalorder %s18_s13, %s18_s13 }
   0xb   :  { %p164_p3 = scmp.ne.s32.totalorder %s18_s13, %s163_s23  ;;  %p169_p5 = scmp.lt.s32.totalorder %s163_s23, %s163_s23 }
   0xd   :  { %p170_p6 = por %p169_p5, %p168_p4 }
   0xf   :  { %p171_p7 = pnand %p170_p6, %p164_p3 }
  0x11   :  { %174 = shalt.err (!%p171_p7)
}
  0x12   :  { %20 = dma.hbm_to_vmem [thread:$0]  %s289_s0, 128, %s18_s13, [#allocation3]  }
  0x13   :  { %s175_s28 = scalar_lea.hbm %s290_s1, 128 }
  0x14   :  { %p176_p8 = scmp.ne.s32.totalorder %s290_s1, %s175_s28  ;;  %p179_p9 = scmp.lt.u32.totalorder %s175_s28, %s290_s1 }
  0x16   :  { %p181_p10 = pnand %p179_p9, %p176_p8 }
  0x18   :  { %184 = shalt.err (!%p181_p10)
}
  0x19   :  { %s185_s6 = scalar_lea.vmem %s28_s15, 128  ;;  %p190_p12 = scmp.lt.s32.totalorder %s28_s15, %s28_s15 }
  0x1a   :  { %p186_p11 = scmp.ne.s32.totalorder %s28_s15, %s185_s6  ;;  %p191_p13 = scmp.lt.s32.totalorder %s185_s6, %s185_s6 }
  0x1c   :  { %p192_p0 = por %p191_p13, %p190_p12 }
  0x1e   :  { %p193_p1 = pnand %p192_p0, %p186_p11 }
  0x20   :  { %196 = shalt.err (!%p193_p1)
}
  0x21   :  { %30 = dma.hbm_to_vmem [thread:$0]  %s290_s1, 128, %s28_s15, [#allocation6]  }
  0x22   :  { %219 = dma.done.wait [#allocation3], 128  }
  0x23   :  { %220 = vsyncadd [#allocation3], 4294967168 }
  0x24   :  { %221 = dma.done.wait [#allocation6], 128  }
  0x25   :  { %222 = vsyncadd [#allocation6], 4294967168  ;;  %v227_v0 = vmov 0.0   ;;  %vm228_vm0 = vmmov 0   ;;  %vm48_vm1 = vcmask 64512   ;;  %v40_v1 = vld [vmem:[#allocation5] sm:$0xff] }
  0x26   :  { %143 = vmatprep.subr.mxu0 %v227_v0  ;;  %145 = vmatprep.mubr.msk.f32.mxu0 %vm228_vm0, %v227_v0  ;;  %v39_v2 = vld [vmem:[#allocation2] sm:$0xff]  ;;  %s229_s10 = smov [#allocation7]  }
  0x27   :  { %144 = vmatpush3.msra.mxu0 %v40_v1  ;;  %v139_v3 = vld [vmem:[%s291_s2] ss:$0 sm:$0xff]  ;;  %s129_s11 = sshll.u32 %s229_s10, 4  ;;  %s130_s11 = int_to_ptr.vmem [resolvable:$true] %s129_s11 }
  0x28   :  { %146 = vmatmul.mubr.msk.f32.vlgmr.msra.gmra.mrb[0].mxu0 %vm48_vm1, %v39_v2  ;;  %s197_s1 = scalar_lea.vmem %s130_s11, 128  ;;  %p202_p3 = scmp.lt.s32.totalorder %s130_s11, %s130_s11 }
  0x29   :  { %p198_p2 = scmp.ne.s32.totalorder %s130_s11, %s197_s1  ;;  %p203_p4 = scmp.lt.s32.totalorder %s197_s1, %s197_s1 }
  0x2b   :  { %p204_p5 = por %p203_p4, %p202_p3 }
  0x2d   :  { %p205_p6 = pnand %p204_p5, %p198_p2 }
  0xfb   :  { %v118_v4 = vpop.f32.mrb[0].mxu0 }
  0xfc   :  { %v119_v5 = vadd.f32 %v139_v3, %v118_v4  ;;  %v147_v6 = vpop.f32.mrb[1].mxu0 }
  0xfe   :  { %122 = vst.msk [vmem:[#allocation7] sm:$0xff] %vm48_vm1, %v119_v5 }
  0xff   :  { %208 = shalt.err (!%p205_p6)
}
 0x100   :  { %s209_s14 = scalar_lea.hbm %s292_s3, 128 }
 0x101   :  { %p210_p7 = scmp.ne.s32.totalorder %s292_s3, %s209_s14  ;;  %p213_p8 = scmp.lt.u32.totalorder %s209_s14, %s292_s3 }
 0x103   :  { %p215_p9 = pnand %p213_p8, %p210_p7 }
 0x105   :  { %218 = shalt.err (!%p215_p9)
}
 0x106   :  { %132 = dma.vmem_to_hbm [thread:$0]  %s130_s11, 128, %s292_s3, [#allocation4]  }
 0x107   :  { %223 = dma.done.wait [#allocation4], 128  }
 0x108   :  { %224 = vsyncadd [#allocation4], 4294967168 }
 0x109   :  { %136 = vsyncpa [#allocation3], 1 }
 0x10a   :  { %137 = vsyncpa [#allocation6], 1 }
 0x10b   :  { %138 = vsyncpa [#allocation4], 1 }

</bundles_post_ra>
